<compile_context>
chip_gen: v5e
topology: v5e:2x2
jax: 0.10.0
libtpu: 0.0.40
codegen_flags: <defaults>
</compile_context>

<pallas_src>
import functools

import numpy as np
import jax
import jax.numpy as jnp
from jax import lax
from jax.experimental import pallas as pl
from jax.experimental.pallas import tpu as pltpu

KERNEL_MUL = 2.0
KERNEL_NUM = 5
GAMMA = 0.001
_LANE = 128
_SUBLANE = 8


# ---------------------------------------------------------------------------
# MMD kernel: one tgt space per grid step; all src spaces resident.
# ---------------------------------------------------------------------------
def _mmd_row_kernel(src_ref, tgt_ref, src_nrm_ref, tgt_nrm_ref, out_ref):
    """src_ref     : (S, N, Dp) f32 — full src stack (constant index_map, 1 DMA)
       tgt_ref     : (1, N, Dp) f32 — tgt[i]
       src_nrm_ref : (S, 1, N)  f32 — per-row squared norms of src, row layout
       tgt_nrm_ref : (1, 1, N)  f32 — per-row squared norms of tgt[i], row layout
       out_ref     : (8, S*128) f32 — row i of the broadcast-scalar output slab
    """
    tgt = tgt_ref[0]                                      # (N, Dp)
    n = tgt.shape[0]
    s_num = src_ref.shape[0]
    inv_nn = jnp.float32(1.0 / float(n * n))
    two_n = 2.0 * float(n)
    bw_denom = jnp.float32(two_n * two_n - two_n)

    # Column-layout norms: VPU square + lane reduce (no eye mask, no transpose).
    sq_t_col = jnp.sum(tgt * tgt, axis=-1, keepdims=True)            # (N, 1)
    sq_t_row = tgt_nrm_ref[0]                                        # (1, N)

    gyy = lax.dot_general(tgt, tgt, (((1,), (1,)), ((), ())),
                          preferred_element_type=jnp.float32)        # (N, N)
    l2yy = jnp.maximum(sq_t_col + sq_t_row - 2.0 * gyy, 0.0)
    sum_l2yy = jnp.sum(l2yy, keepdims=True)                          # (1, 1)

    def _kernel_sum(l2, base):
        # 5 Gaussian kernels: bandwidths are geometric (ratio 2), so
        # exp once at the largest bandwidth and square repeatedly (VALU).
        e = jnp.exp(l2 * base)
        acc = e
        for _ in range(KERNEL_NUM - 1):
            e = e * e
            acc = acc + e
        return jnp.sum(acc, keepdims=True)                           # (1, 1)

    # TODO(synk): for production S / N / D, replace this unrolled loop with a
    # second grid axis (or fori_loop), tile rows/cols with a Dp-reduction and a
    # small VMEM accumulator, use the closed-form bandwidth terms, and set
    # vmem_limit_bytes so the working set stays inside v7x's 64 MiB VMEM.
    for j in range(s_num):
        src = src_ref[j]                                             # (N, Dp)
        sq_s_col = jnp.sum(src * src, axis=-1, keepdims=True)        # (N, 1)
        sq_s_row = src_nrm_ref[j]                                    # (1, N)

        gxx = lax.dot_general(src, src, (((1,), (1,)), ((), ())),
                              preferred_element_type=jnp.float32)
        gxy = lax.dot_general(src, tgt, (((1,), (1,)), ((), ())),
                              preferred_element_type=jnp.float32)
        l2xx = jnp.maximum(sq_s_col + sq_s_row - 2.0 * gxx, 0.0)
        l2xy = jnp.maximum(sq_s_col + sq_t_row - 2.0 * gxy, 0.0)

        # Pair-specific bandwidth from the three quadrant sums (XY counted twice).
        bw = (jnp.sum(l2xx, keepdims=True) + sum_l2yy
              + 2.0 * jnp.sum(l2xy, keepdims=True)) / bw_denom
        bw = bw / jnp.float32(KERNEL_MUL ** (KERNEL_NUM // 2))
        # Guard 0/0 when all 2N samples are identical (not in the reference;
        # only diverges in that degenerate case).
        bw = jnp.maximum(bw, 1e-12)
        inv_bw = pl.reciprocal(bw)                  # one scalar divide per pair
        base = inv_bw * jnp.float32(-1.0 / (KERNEL_MUL ** (KERNEL_NUM - 1)))

        mmd = (_kernel_sum(l2xx, base) + _kernel_sum(l2yy, base)
               - 2.0 * _kernel_sum(l2xy, base)) * inv_nn             # (1, 1)

        # Aligned, unmasked (8,128) lane-dense store for pair (i, j).
        out_ref[:, j * _LANE:(j + 1) * _LANE] = jnp.broadcast_to(
            mmd, (_SUBLANE, _LANE))


def pairwise_mmd_dist(src_stack, tgt_stack):
    """All-pairs MMD distances: dist[i, j] = MMD(src_stack[j], tgt_stack[i])."""
    s_num, n_src, d = src_stack.shape
    t_num, n_tgt, d_t = tgt_stack.shape
    assert n_src == n_tgt and d == d_t, "equal sample counts / hidden size expected"

    src_stack = src_stack.astype(jnp.float32)
    tgt_stack = tgt_stack.astype(jnp.float32)

    # Per-space squared row norms, precomputed once in row layout so the kernel
    # needs no (N,1)->(1,N) transpose and no per-pair recompute.
    src_nrm = jnp.sum(src_stack * src_stack, axis=-1)[:, None, :]    # (S, 1, N)
    tgt_nrm = jnp.sum(tgt_stack * tgt_stack, axis=-1)[:, None, :]    # (T, 1, N)

    # Zero-pad hidden dim to a lane-aligned multiple of 128: zeros do not change
    # any dot product / norm but keep the MXU matmuls aligned.
    d_pad = max(_LANE, ((d + _LANE - 1) // _LANE) * _LANE)
    if d_pad != d:
        pad = ((0, 0), (0, 0), (0, d_pad - d))
        src_stack = jnp.pad(src_stack, pad)
        tgt_stack = jnp.pad(tgt_stack, pad)

    out = pl.pallas_call(
        _mmd_row_kernel,
        out_shape=jax.ShapeDtypeStruct((t_num * _SUBLANE, s_num * _LANE),
                                       jnp.float32),
        grid=(t_num,),
        in_specs=[
            # Full src stack + norms: constant block index -> DMAed once, resident.
            pl.BlockSpec((s_num, n_src, d_pad), lambda i: (0, 0, 0)),
            pl.BlockSpec((1, n_tgt, d_pad), lambda i: (i, 0, 0)),
            pl.BlockSpec((s_num, 1, n_src), lambda i: (0, 0, 0)),
            pl.BlockSpec((1, 1, n_tgt), lambda i: (i, 0, 0)),
        ],
        out_specs=pl.BlockSpec((_SUBLANE, s_num * _LANE), lambda i: (i, 0)),
        compiler_params=pltpu.CompilerParams(
            dimension_semantics=("parallel",)),   # t_num >= 2 feeds both v7x TCs
    )(src_stack, tgt_stack, src_nrm, tgt_nrm)

    # Each (8, 128) block holds one broadcast scalar; pick element [0, 0].
    return out.reshape(t_num, _SUBLANE, s_num, _LANE)[:, 0, :, 0]    # (T, S)


# ---------------------------------------------------------------------------
# Whole forward under a single jit: Pallas dist kernel + jnp bookkeeping + WCE.
# ---------------------------------------------------------------------------
@functools.partial(jax.jit, static_argnames=("top_k", "gamma"))
def transfer_mmd_loss_forward(prob, labels, src_stack, tgt_stack, *, top_k=1,
                              gamma=GAMMA):
    # --- match loss: all-pairs MMD (Pallas) + top-k mask / log-ratio (jnp) ---
    dist = pairwise_mmd_dist(src_stack, tgt_stack)                   # (T, S)
    kth = jnp.sort(dist, axis=1)[:, top_k - 1:top_k]                 # k-th smallest per row
    # Value-membership semantics (ties included), matching the reference.
    num_mask = (dist <= kth).astype(jnp.float32)
    numerator = jnp.sum(dist * num_mask)
    denominator = jnp.sum(dist * (1.0 - num_mask))
    match_loss = jnp.log(numerator / denominator)

    # --- weighted cross entropy: nn.CrossEntropyLoss(weight=[0.1, 0.8]) -----
    # (B, 2) is tens of flops; plain jnp fused into this jit — a dedicated
    # Pallas kernel would cost more in launch + masked stores than the math.
    w = jnp.array([0.1, 0.8], jnp.float32)
    logp = jax.nn.log_softmax(prob.astype(jnp.float32), axis=-1)
    labels = labels.astype(jnp.int32)
    logp_y = jnp.take_along_axis(logp, labels[:, None], axis=1)[:, 0]
    w_y = w[labels]
    cls_loss = jnp.sum(w_y * (-logp_y)) / jnp.sum(w_y)

    return cls_loss + jnp.float32(gamma) * match_loss


# ---------------------------------------------------------------------------
# Pure numpy (float64) reference of the PyTorch module, for a sanity check.
# ---------------------------------------------------------------------------
def _mmd_ref(src, tgt):
    total = np.concatenate([src, tgt], axis=0).astype(np.float64)
    diff = total[None, :, :] - total[:, None, :]
    l2 = (diff * diff).sum(axis=2)
    ns = total.shape[0]
    bw = l2.sum() / (ns * ns - ns) / (KERNEL_MUL ** (KERNEL_NUM // 2))
    k = sum(np.exp(-l2 / (bw * KERNEL_MUL ** i)) for i in range(KERNEL_NUM))
    n = src.shape[0]
    return float((k[:n, :n] + k[n:, n:] - k[:n, n:] - k[n:, :n]).mean())


def _reference_forward(prob, labels, src_stack, tgt_stack, top_k=1, gamma=GAMMA):
    t_num, s_num = tgt_stack.shape[0], src_stack.shape[0]
    dist = np.zeros((t_num, s_num), dtype=np.float64)
    for i in range(t_num):
        for j in range(s_num):
            dist[i, j] = _mmd_ref(src_stack[j], tgt_stack[i])
    num_m = np.zeros_like(dist)
    den_m = np.ones_like(dist)
    for i in range(t_num):
        top = sorted(list(dist[i]))[:top_k]
        for j in range(s_num):
            if dist[i, j] in top:
                num_m[i, j] = 1.0
                den_m[i, j] = 0.0
    match_loss = np.log((dist * num_m).sum() / (dist * den_m).sum())

    w = np.array([0.1, 0.8], np.float64)
    p = np.asarray(prob, np.float64)
    m = p.max(axis=1, keepdims=True)
    logp = p - (m + np.log(np.exp(p - m).sum(axis=1, keepdims=True)))
    lbl = np.asarray(labels)
    logp_y = logp[np.arange(p.shape[0]), lbl]
    w_y = w[lbl]
    cls = np.sum(w_y * (-logp_y)) / np.sum(w_y)
    return cls + gamma * match_loss


if __name__ == "__main__":
    key = jax.random.PRNGKey(0)
    keys = jax.random.split(key, 8)

    # Small synthetic setup consistent with the module:
    B, C = 8, 2                 # classifier batch, 2 classes
    N, D = 8, 32                # samples per hour-space, hidden size
    src_num_space, tgt_num_space = 3, 2

    src_stack = jnp.stack([
        jax.random.normal(keys[k], (N, D), dtype=jnp.float32) + float(k)
        for k in range(src_num_space)
    ])                                                   # (3, N, D)
    tgt_stack = jnp.stack([
        jax.random.normal(keys[3 + k], (N, D), dtype=jnp.float32) + float(k) + 0.1
        for k in range(tgt_num_space)
    ])                                                   # (2, N, D)

    prob = jax.random.normal(keys[6], (B, C), dtype=jnp.float32)
    labels = jax.random.randint(keys[7], (B,), 0, C, dtype=jnp.int32)

    out = transfer_mmd_loss_forward(prob, labels, src_stack, tgt_stack,
                                    top_k=1, gamma=GAMMA)
    out = jax.block_until_ready(out)

    ref = _reference_forward(np.asarray(prob), np.asarray(labels),
                             np.asarray(src_stack), np.asarray(tgt_stack),
                             top_k=1, gamma=GAMMA)
    np.testing.assert_allclose(float(out), float(ref), rtol=1e-3, atol=1e-5)
    print("KERNEL_OK")
</pallas_src>

<mosaic_0001>
module attributes {stable_mosaic.version = 11 : i64} {
  func.func @_mmd_row_kernel(%arg0: i32, %arg1: memref<3x8x128xf32, #tpu.memory_space<vmem>>, %arg2: memref<1x8x128xf32, #tpu.memory_space<vmem>>, %arg3: memref<3x1x8xf32, #tpu.memory_space<vmem>>, %arg4: memref<1x1x8xf32, #tpu.memory_space<vmem>>, %arg5: memref<8x384xf32, #tpu.memory_space<vmem>>) attributes {dimension_semantics = [#tpu.dimension_semantics<parallel>], iteration_bounds = array<i64: 2>, scalar_prefetch = 0 : i64, scratch_operands = 0 : i64, tpu.core_type = #tpu.core_type<tc>, window_params = [{pipeline_mode = #tpu.pipeline_mode<synchronous>, transform_indices = @transform_0, window_bounds = array<i64: 3, 8, 128>}, {transform_indices = @transform_1, window_bounds = array<i64: 1, 8, 128>}, {pipeline_mode = #tpu.pipeline_mode<synchronous>, transform_indices = @transform_2, window_bounds = array<i64: 3, 1, 8>}, {transform_indices = @transform_3, window_bounds = array<i64: 1, 1, 8>}, {transform_indices = @transform_4, window_bounds = array<i64: 8, 384>}]} {
    %c0 = arith.constant 0 : index
    %c0_0 = arith.constant 0 : index
    %c0_1 = arith.constant 0 : index
    %0 = vector.load %arg2[%c0, %c0_0, %c0_1] : memref<1x8x128xf32, #tpu.memory_space<vmem>>, vector<1x8x128xf32>
    %1 = vector.shape_cast %0 : vector<1x8x128xf32> to vector<8x128xf32>
    %2 = arith.mulf %1, %1 : vector<8x128xf32>
    %cst = arith.constant dense<0.000000e+00> : vector<8xf32>
    %3 = vector.multi_reduction <add>, %2, %cst [1] : vector<8x128xf32> to vector<8xf32>
    %4 = vector.shape_cast %3 : vector<8xf32> to vector<8x1xf32>
    %c0_2 = arith.constant 0 : index
    %c0_3 = arith.constant 0 : index
    %c0_4 = arith.constant 0 : index
    %5 = vector.load %arg4[%c0_2, %c0_3, %c0_4] : memref<1x1x8xf32, #tpu.memory_space<vmem>>, vector<1x1x8xf32>
    %6 = vector.shape_cast %5 : vector<1x1x8xf32> to vector<1x8xf32>
    %cst_5 = arith.constant dense<0.000000e+00> : vector<8x8xf32>
    %7 = tpu.matmul %1, %1, %cst_5 {dimension_numbers = #tpu.dot_dimension_numbers<[1], [1], [0], [0], [0, 0, 1, 0], [], []>} : vector<8x128xf32>, vector<8x128xf32>, vector<8x8xf32> -> vector<8x8xf32>
    %8 = vector.broadcast %4 : vector<8x1xf32> to vector<8x8xf32>
    %9 = vector.broadcast %6 : vector<1x8xf32> to vector<8x8xf32>
    %10 = arith.addf %8, %9 : vector<8x8xf32>
    %cst_6 = arith.constant 2.000000e+00 : f32
    %11 = vector.broadcast %cst_6 : f32 to vector<8x8xf32>
    %12 = arith.mulf %11, %7 : vector<8x8xf32>
    %13 = arith.subf %10, %12 : vector<8x8xf32>
    %cst_7 = arith.constant 0.000000e+00 : f32
    %14 = vector.broadcast %cst_7 : f32 to vector<8x8xf32>
    %15 = arith.maximumf %13, %14 : vector<8x8xf32>
    %16 = vector.shape_cast %15 : vector<8x8xf32> to vector<1x8x8xf32>
    %cst_8 = arith.constant dense<0.000000e+00> : vector<1xf32>
    %17 = vector.multi_reduction <add>, %16, %cst_8 [1, 2] : vector<1x8x8xf32> to vector<1xf32>
    %18 = vector.shape_cast %17 : vector<1xf32> to vector<1x1x1xf32>
    %19 = vector.extract %18[0, 0, 0] : f32 from vector<1x1x1xf32>
    %20 = vector.broadcast %19 : f32 to vector<1x1xf32>
    %c0_9 = arith.constant 0 : index
    %c0_10 = arith.constant 0 : index
    %c0_11 = arith.constant 0 : index
    %21 = vector.load %arg1[%c0_9, %c0_10, %c0_11] : memref<3x8x128xf32, #tpu.memory_space<vmem>>, vector<1x8x128xf32>
    %22 = vector.shape_cast %21 : vector<1x8x128xf32> to vector<8x128xf32>
    %23 = arith.mulf %22, %22 : vector<8x128xf32>
    %cst_12 = arith.constant dense<0.000000e+00> : vector<8xf32>
    %24 = vector.multi_reduction <add>, %23, %cst_12 [1] : vector<8x128xf32> to vector<8xf32>
    %25 = vector.shape_cast %24 : vector<8xf32> to vector<8x1xf32>
    %c0_13 = arith.constant 0 : index
    %c0_14 = arith.constant 0 : index
    %c0_15 = arith.constant 0 : index
    %26 = vector.load %arg3[%c0_13, %c0_14, %c0_15] : memref<3x1x8xf32, #tpu.memory_space<vmem>>, vector<1x1x8xf32>
    %27 = vector.shape_cast %26 : vector<1x1x8xf32> to vector<1x8xf32>
    %cst_16 = arith.constant dense<0.000000e+00> : vector<8x8xf32>
    %28 = tpu.matmul %22, %22, %cst_16 {dimension_numbers = #tpu.dot_dimension_numbers<[1], [1], [0], [0], [0, 0, 1, 0], [], []>} : vector<8x128xf32>, vector<8x128xf32>, vector<8x8xf32> -> vector<8x8xf32>
    %cst_17 = arith.constant dense<0.000000e+00> : vector<8x8xf32>
    %29 = tpu.matmul %22, %1, %cst_17 {dimension_numbers = #tpu.dot_dimension_numbers<[1], [1], [0], [0], [0, 0, 1, 0], [], []>} : vector<8x128xf32>, vector<8x128xf32>, vector<8x8xf32> -> vector<8x8xf32>
    %30 = vector.broadcast %25 : vector<8x1xf32> to vector<8x8xf32>
    %31 = vector.broadcast %27 : vector<1x8xf32> to vector<8x8xf32>
    %32 = arith.addf %30, %31 : vector<8x8xf32>
    %cst_18 = arith.constant 2.000000e+00 : f32
    %33 = vector.broadcast %cst_18 : f32 to vector<8x8xf32>
    %34 = arith.mulf %33, %28 : vector<8x8xf32>
    %35 = arith.subf %32, %34 : vector<8x8xf32>
    %cst_19 = arith.constant 0.000000e+00 : f32
    %36 = vector.broadcast %cst_19 : f32 to vector<8x8xf32>
    %37 = arith.maximumf %35, %36 : vector<8x8xf32>
    %38 = vector.broadcast %25 : vector<8x1xf32> to vector<8x8xf32>
    %39 = vector.broadcast %6 : vector<1x8xf32> to vector<8x8xf32>
    %40 = arith.addf %38, %39 : vector<8x8xf32>
    %cst_20 = arith.constant 2.000000e+00 : f32
    %41 = vector.broadcast %cst_20 : f32 to vector<8x8xf32>
    %42 = arith.mulf %41, %29 : vector<8x8xf32>
    %43 = arith.subf %40, %42 : vector<8x8xf32>
    %cst_21 = arith.constant 0.000000e+00 : f32
    %44 = vector.broadcast %cst_21 : f32 to vector<8x8xf32>
    %45 = arith.maximumf %43, %44 : vector<8x8xf32>
    %46 = vector.shape_cast %37 : vector<8x8xf32> to vector<1x8x8xf32>
    %cst_22 = arith.constant dense<0.000000e+00> : vector<1xf32>
    %47 = vector.multi_reduction <add>, %46, %cst_22 [1, 2] : vector<1x8x8xf32> to vector<1xf32>
    %48 = vector.shape_cast %47 : vector<1xf32> to vector<1x1x1xf32>
    %49 = vector.extract %48[0, 0, 0] : f32 from vector<1x1x1xf32>
    %50 = vector.broadcast %49 : f32 to vector<1x1xf32>
    %51 = arith.addf %50, %20 : vector<1x1xf32>
    %52 = vector.shape_cast %45 : vector<8x8xf32> to vector<1x8x8xf32>
    %cst_23 = arith.constant dense<0.000000e+00> : vector<1xf32>
    %53 = vector.multi_reduction <add>, %52, %cst_23 [1, 2] : vector<1x8x8xf32> to vector<1xf32>
    %54 = vector.shape_cast %53 : vector<1xf32> to vector<1x1x1xf32>
    %55 = vector.extract %54[0, 0, 0] : f32 from vector<1x1x1xf32>
    %56 = vector.broadcast %55 : f32 to vector<1x1xf32>
    %cst_24 = arith.constant 2.000000e+00 : f32
    %57 = vector.broadcast %cst_24 : f32 to vector<1x1xf32>
    %58 = arith.mulf %57, %56 : vector<1x1xf32>
    %59 = arith.addf %51, %58 : vector<1x1xf32>
    %cst_25 = arith.constant 2.400000e+02 : f32
    %60 = vector.broadcast %cst_25 : f32 to vector<1x1xf32>
    %61 = arith.divf %59, %60 : vector<1x1xf32>
    %cst_26 = arith.constant 4.000000e+00 : f32
    %62 = vector.broadcast %cst_26 : f32 to vector<1x1xf32>
    %63 = arith.divf %61, %62 : vector<1x1xf32>
    %cst_27 = arith.constant 9.99999996E-13 : f32
    %64 = vector.broadcast %cst_27 : f32 to vector<1x1xf32>
    %65 = arith.maximumf %63, %64 : vector<1x1xf32>
    %66 = tpu.reciprocal %65 : vector<1x1xf32> -> vector<1x1xf32>
    %cst_28 = arith.constant -6.250000e-02 : f32
    %67 = vector.broadcast %cst_28 : f32 to vector<1x1xf32>
    %68 = arith.mulf %66, %67 : vector<1x1xf32>
    %69 = vector.broadcast %68 : vector<1x1xf32> to vector<8x8xf32>
    %70 = arith.mulf %37, %69 : vector<8x8xf32>
    %71 = math.exp %70 : vector<8x8xf32>
    %72 = arith.mulf %71, %71 : vector<8x8xf32>
    %73 = arith.addf %71, %72 : vector<8x8xf32>
    %74 = arith.mulf %72, %72 : vector<8x8xf32>
    %75 = arith.addf %73, %74 : vector<8x8xf32>
    %76 = arith.mulf %74, %74 : vector<8x8xf32>
    %77 = arith.addf %75, %76 : vector<8x8xf32>
    %78 = arith.mulf %76, %76 : vector<8x8xf32>
    %79 = arith.addf %77, %78 : vector<8x8xf32>
    %80 = vector.shape_cast %79 : vector<8x8xf32> to vector<1x8x8xf32>
    %cst_29 = arith.constant dense<0.000000e+00> : vector<1xf32>
    %81 = vector.multi_reduction <add>, %80, %cst_29 [1, 2] : vector<1x8x8xf32> to vector<1xf32>
    %82 = vector.shape_cast %81 : vector<1xf32> to vector<1x1x1xf32>
    %83 = vector.extract %82[0, 0, 0] : f32 from vector<1x1x1xf32>
    %84 = vector.broadcast %83 : f32 to vector<1x1xf32>
    %85 = vector.broadcast %68 : vector<1x1xf32> to vector<8x8xf32>
    %86 = arith.mulf %15, %85 : vector<8x8xf32>
    %87 = math.exp %86 : vector<8x8xf32>
    %88 = arith.mulf %87, %87 : vector<8x8xf32>
    %89 = arith.addf %87, %88 : vector<8x8xf32>
    %90 = arith.mulf %88, %88 : vector<8x8xf32>
    %91 = arith.addf %89, %90 : vector<8x8xf32>
    %92 = arith.mulf %90, %90 : vector<8x8xf32>
    %93 = arith.addf %91, %92 : vector<8x8xf32>
    %94 = arith.mulf %92, %92 : vector<8x8xf32>
    %95 = arith.addf %93, %94 : vector<8x8xf32>
    %96 = vector.shape_cast %95 : vector<8x8xf32> to vector<1x8x8xf32>
    %cst_30 = arith.constant dense<0.000000e+00> : vector<1xf32>
    %97 = vector.multi_reduction <add>, %96, %cst_30 [1, 2] : vector<1x8x8xf32> to vector<1xf32>
    %98 = vector.shape_cast %97 : vector<1xf32> to vector<1x1x1xf32>
    %99 = vector.extract %98[0, 0, 0] : f32 from vector<1x1x1xf32>
    %100 = vector.broadcast %99 : f32 to vector<1x1xf32>
    %101 = arith.addf %84, %100 : vector<1x1xf32>
    %102 = vector.broadcast %68 : vector<1x1xf32> to vector<8x8xf32>
    %103 = arith.mulf %45, %102 : vector<8x8xf32>
    %104 = math.exp %103 : vector<8x8xf32>
    %105 = arith.mulf %104, %104 : vector<8x8xf32>
    %106 = arith.addf %104, %105 : vector<8x8xf32>
    %107 = arith.mulf %105, %105 : vector<8x8xf32>
    %108 = arith.addf %106, %107 : vector<8x8xf32>
    %109 = arith.mulf %107, %107 : vector<8x8xf32>
    %110 = arith.addf %108, %109 : vector<8x8xf32>
    %111 = arith.mulf %109, %109 : vector<8x8xf32>
    %112 = arith.addf %110, %111 : vector<8x8xf32>
    %113 = vector.shape_cast %112 : vector<8x8xf32> to vector<1x8x8xf32>
    %cst_31 = arith.constant dense<0.000000e+00> : vector<1xf32>
    %114 = vector.multi_reduction <add>, %113, %cst_31 [1, 2] : vector<1x8x8xf32> to vector<1xf32>
    %115 = vector.shape_cast %114 : vector<1xf32> to vector<1x1x1xf32>
    %116 = vector.extract %115[0, 0, 0] : f32 from vector<1x1x1xf32>
    %117 = vector.broadcast %116 : f32 to vector<1x1xf32>
    %cst_32 = arith.constant 2.000000e+00 : f32
    %118 = vector.broadcast %cst_32 : f32 to vector<1x1xf32>
    %119 = arith.mulf %118, %117 : vector<1x1xf32>
    %120 = arith.subf %101, %119 : vector<1x1xf32>
    %cst_33 = arith.constant 1.562500e-02 : f32
    %121 = vector.broadcast %cst_33 : f32 to vector<1x1xf32>
    %122 = arith.mulf %120, %121 : vector<1x1xf32>
    %123 = vector.shape_cast %122 : vector<1x1xf32> to vector<1x1xf32>
    %124 = vector.broadcast %123 : vector<1x1xf32> to vector<8x128xf32>
    %c0_34 = arith.constant 0 : index
    %c0_35 = arith.constant 0 : index
    %125 = vector.load %arg5[%c0_34, %c0_35] : memref<8x384xf32, #tpu.memory_space<vmem>>, vector<8x128xf32>
    tpu.vector_store %arg5[%c0_34, %c0_35], %124 {strides = array<i32>} : memref<8x384xf32, #tpu.memory_space<vmem>>, vector<8x128xf32>,
    %c1 = arith.constant 1 : index
    %c0_36 = arith.constant 0 : index
    %c0_37 = arith.constant 0 : index
    %126 = vector.load %arg1[%c1, %c0_36, %c0_37] : memref<3x8x128xf32, #tpu.memory_space<vmem>>, vector<1x8x128xf32>
    %127 = vector.shape_cast %126 : vector<1x8x128xf32> to vector<8x128xf32>
    %128 = arith.mulf %127, %127 : vector<8x128xf32>
    %cst_38 = arith.constant dense<0.000000e+00> : vector<8xf32>
    %129 = vector.multi_reduction <add>, %128, %cst_38 [1] : vector<8x128xf32> to vector<8xf32>
    %130 = vector.shape_cast %129 : vector<8xf32> to vector<8x1xf32>
    %c1_39 = arith.constant 1 : index
    %c0_40 = arith.constant 0 : index
    %c0_41 = arith.constant 0 : index
    %131 = vector.load %arg3[%c1_39, %c0_40, %c0_41] : memref<3x1x8xf32, #tpu.memory_space<vmem>>, vector<1x1x8xf32>
    %132 = vector.shape_cast %131 : vector<1x1x8xf32> to vector<1x8xf32>
    %cst_42 = arith.constant dense<0.000000e+00> : vector<8x8xf32>
    %133 = tpu.matmul %127, %127, %cst_42 {dimension_numbers = #tpu.dot_dimension_numbers<[1], [1], [0], [0], [0, 0, 1, 0], [], []>} : vector<8x128xf32>, vector<8x128xf32>, vector<8x8xf32> -> vector<8x8xf32>
    %cst_43 = arith.constant dense<0.000000e+00> : vector<8x8xf32>
    %134 = tpu.matmul %127, %1, %cst_43 {dimension_numbers = #tpu.dot_dimension_numbers<[1], [1], [0], [0], [0, 0, 1, 0], [], []>} : vector<8x128xf32>, vector<8x128xf32>, vector<8x8xf32> -> vector<8x8xf32>
    %135 = vector.broadcast %130 : vector<8x1xf32> to vector<8x8xf32>
    %136 = vector.broadcast %132 : vector<1x8xf32> to vector<8x8xf32>
    %137 = arith.addf %135, %136 : vector<8x8xf32>
    %cst_44 = arith.constant 2.000000e+00 : f32
    %138 = vector.broadcast %cst_44 : f32 to vector<8x8xf32>
    %139 = arith.mulf %138, %133 : vector<8x8xf32>
    %140 = arith.subf %137, %139 : vector<8x8xf32>
    %cst_45 = arith.constant 0.000000e+00 : f32
    %141 = vector.broadcast %cst_45 : f32 to vector<8x8xf32>
    %142 = arith.maximumf %140, %141 : vector<8x8xf32>
    %143 = vector.broadcast %130 : vector<8x1xf32> to vector<8x8xf32>
    %144 = vector.broadcast %6 : vector<1x8xf32> to vector<8x8xf32>
    %145 = arith.addf %143, %144 : vector<8x8xf32>
    %cst_46 = arith.constant 2.000000e+00 : f32
    %146 = vector.broadcast %cst_46 : f32 to vector<8x8xf32>
    %147 = arith.mulf %146, %134 : vector<8x8xf32>
    %148 = arith.subf %145, %147 : vector<8x8xf32>
    %cst_47 = arith.constant 0.000000e+00 : f32
    %149 = vector.broadcast %cst_47 : f32 to vector<8x8xf32>
    %150 = arith.maximumf %148, %149 : vector<8x8xf32>
    %151 = vector.shape_cast %142 : vector<8x8xf32> to vector<1x8x8xf32>
    %cst_48 = arith.constant dense<0.000000e+00> : vector<1xf32>
    %152 = vector.multi_reduction <add>, %151, %cst_48 [1, 2] : vector<1x8x8xf32> to vector<1xf32>
    %153 = vector.shape_cast %152 : vector<1xf32> to vector<1x1x1xf32>
    %154 = vector.extract %153[0, 0, 0] : f32 from vector<1x1x1xf32>
    %155 = vector.broadcast %154 : f32 to vector<1x1xf32>
    %156 = arith.addf %155, %20 : vector<1x1xf32>
    %157 = vector.shape_cast %150 : vector<8x8xf32> to vector<1x8x8xf32>
    %cst_49 = arith.constant dense<0.000000e+00> : vector<1xf32>
    %158 = vector.multi_reduction <add>, %157, %cst_49 [1, 2] : vector<1x8x8xf32> to vector<1xf32>
    %159 = vector.shape_cast %158 : vector<1xf32> to vector<1x1x1xf32>
    %160 = vector.extract %159[0, 0, 0] : f32 from vector<1x1x1xf32>
    %161 = vector.broadcast %160 : f32 to vector<1x1xf32>
    %cst_50 = arith.constant 2.000000e+00 : f32
    %162 = vector.broadcast %cst_50 : f32 to vector<1x1xf32>
    %163 = arith.mulf %162, %161 : vector<1x1xf32>
    %164 = arith.addf %156, %163 : vector<1x1xf32>
    %cst_51 = arith.constant 2.400000e+02 : f32
    %165 = vector.broadcast %cst_51 : f32 to vector<1x1xf32>
    %166 = arith.divf %164, %165 : vector<1x1xf32>
    %cst_52 = arith.constant 4.000000e+00 : f32
    %167 = vector.broadcast %cst_52 : f32 to vector<1x1xf32>
    %168 = arith.divf %166, %167 : vector<1x1xf32>
    %cst_53 = arith.constant 9.99999996E-13 : f32
    %169 = vector.broadcast %cst_53 : f32 to vector<1x1xf32>
    %170 = arith.maximumf %168, %169 : vector<1x1xf32>
    %171 = tpu.reciprocal %170 : vector<1x1xf32> -> vector<1x1xf32>
    %cst_54 = arith.constant -6.250000e-02 : f32
    %172 = vector.broadcast %cst_54 : f32 to vector<1x1xf32>
    %173 = arith.mulf %171, %172 : vector<1x1xf32>
    %174 = vector.broadcast %173 : vector<1x1xf32> to vector<8x8xf32>
    %175 = arith.mulf %142, %174 : vector<8x8xf32>
    %176 = math.exp %175 : vector<8x8xf32>
    %177 = arith.mulf %176, %176 : vector<8x8xf32>
    %178 = arith.addf %176, %177 : vector<8x8xf32>
    %179 = arith.mulf %177, %177 : vector<8x8xf32>
    %180 = arith.addf %178, %179 : vector<8x8xf32>
    %181 = arith.mulf %179, %179 : vector<8x8xf32>
    %182 = arith.addf %180, %181 : vector<8x8xf32>
    %183 = arith.mulf %181, %181 : vector<8x8xf32>
    %184 = arith.addf %182, %183 : vector<8x8xf32>
    %185 = vector.shape_cast %184 : vector<8x8xf32> to vector<1x8x8xf32>
    %cst_55 = arith.constant dense<0.000000e+00> : vector<1xf32>
    %186 = vector.multi_reduction <add>, %185, %cst_55 [1, 2] : vector<1x8x8xf32> to vector<1xf32>
    %187 = vector.shape_cast %186 : vector<1xf32> to vector<1x1x1xf32>
    %188 = vector.extract %187[0, 0, 0] : f32 from vector<1x1x1xf32>
    %189 = vector.broadcast %188 : f32 to vector<1x1xf32>
    %190 = vector.broadcast %173 : vector<1x1xf32> to vector<8x8xf32>
    %191 = arith.mulf %15, %190 : vector<8x8xf32>
    %192 = math.exp %191 : vector<8x8xf32>
    %193 = arith.mulf %192, %192 : vector<8x8xf32>
    %194 = arith.addf %192, %193 : vector<8x8xf32>
    %195 = arith.mulf %193, %193 : vector<8x8xf32>
    %196 = arith.addf %194, %195 : vector<8x8xf32>
    %197 = arith.mulf %195, %195 : vector<8x8xf32>
    %198 = arith.addf %196, %197 : vector<8x8xf32>
    %199 = arith.mulf %197, %197 : vector<8x8xf32>
    %200 = arith.addf %198, %199 : vector<8x8xf32>
    %201 = vector.shape_cast %200 : vector<8x8xf32> to vector<1x8x8xf32>
    %cst_56 = arith.constant dense<0.000000e+00> : vector<1xf32>
    %202 = vector.multi_reduction <add>, %201, %cst_56 [1, 2] : vector<1x8x8xf32> to vector<1xf32>
    %203 = vector.shape_cast %202 : vector<1xf32> to vector<1x1x1xf32>
    %204 = vector.extract %203[0, 0, 0] : f32 from vector<1x1x1xf32>
    %205 = vector.broadcast %204 : f32 to vector<1x1xf32>
    %206 = arith.addf %189, %205 : vector<1x1xf32>
    %207 = vector.broadcast %173 : vector<1x1xf32> to vector<8x8xf32>
    %208 = arith.mulf %150, %207 : vector<8x8xf32>
    %209 = math.exp %208 : vector<8x8xf32>
    %210 = arith.mulf %209, %209 : vector<8x8xf32>
    %211 = arith.addf %209, %210 : vector<8x8xf32>
    %212 = arith.mulf %210, %210 : vector<8x8xf32>
    %213 = arith.addf %211, %212 : vector<8x8xf32>
    %214 = arith.mulf %212, %212 : vector<8x8xf32>
    %215 = arith.addf %213, %214 : vector<8x8xf32>
    %216 = arith.mulf %214, %214 : vector<8x8xf32>
    %217 = arith.addf %215, %216 : vector<8x8xf32>
    %218 = vector.shape_cast %217 : vector<8x8xf32> to vector<1x8x8xf32>
    %cst_57 = arith.constant dense<0.000000e+00> : vector<1xf32>
    %219 = vector.multi_reduction <add>, %218, %cst_57 [1, 2] : vector<1x8x8xf32> to vector<1xf32>
    %220 = vector.shape_cast %219 : vector<1xf32> to vector<1x1x1xf32>
    %221 = vector.extract %220[0, 0, 0] : f32 from vector<1x1x1xf32>
    %222 = vector.broadcast %221 : f32 to vector<1x1xf32>
    %cst_58 = arith.constant 2.000000e+00 : f32
    %223 = vector.broadcast %cst_58 : f32 to vector<1x1xf32>
    %224 = arith.mulf %223, %222 : vector<1x1xf32>
    %225 = arith.subf %206, %224 : vector<1x1xf32>
    %cst_59 = arith.constant 1.562500e-02 : f32
    %226 = vector.broadcast %cst_59 : f32 to vector<1x1xf32>
    %227 = arith.mulf %225, %226 : vector<1x1xf32>
    %228 = vector.shape_cast %227 : vector<1x1xf32> to vector<1x1xf32>
    %229 = vector.broadcast %228 : vector<1x1xf32> to vector<8x128xf32>
    %c0_60 = arith.constant 0 : index
    %c128 = arith.constant 128 : index
    %230 = vector.load %arg5[%c0_60, %c128] : memref<8x384xf32, #tpu.memory_space<vmem>>, vector<8x128xf32>
    tpu.vector_store %arg5[%c0_60, %c128], %229 {strides = array<i32>} : memref<8x384xf32, #tpu.memory_space<vmem>>, vector<8x128xf32>,
    %c2 = arith.constant 2 : index
    %c0_61 = arith.constant 0 : index
    %c0_62 = arith.constant 0 : index
    %231 = vector.load %arg1[%c2, %c0_61, %c0_62] : memref<3x8x128xf32, #tpu.memory_space<vmem>>, vector<1x8x128xf32>
    %232 = vector.shape_cast %231 : vector<1x8x128xf32> to vector<8x128xf32>
    %233 = arith.mulf %232, %232 : vector<8x128xf32>
    %cst_63 = arith.constant dense<0.000000e+00> : vector<8xf32>
    %234 = vector.multi_reduction <add>, %233, %cst_63 [1] : vector<8x128xf32> to vector<8xf32>
    %235 = vector.shape_cast %234 : vector<8xf32> to vector<8x1xf32>
    %c2_64 = arith.constant 2 : index
    %c0_65 = arith.constant 0 : index
    %c0_66 = arith.constant 0 : index
    %236 = vector.load %arg3[%c2_64, %c0_65, %c0_66] : memref<3x1x8xf32, #tpu.memory_space<vmem>>, vector<1x1x8xf32>
    %237 = vector.shape_cast %236 : vector<1x1x8xf32> to vector<1x8xf32>
    %cst_67 = arith.constant dense<0.000000e+00> : vector<8x8xf32>
    %238 = tpu.matmul %232, %232, %cst_67 {dimension_numbers = #tpu.dot_dimension_numbers<[1], [1], [0], [0], [0, 0, 1, 0], [], []>} : vector<8x128xf32>, vector<8x128xf32>, vector<8x8xf32> -> vector<8x8xf32>
    %cst_68 = arith.constant dense<0.000000e+00> : vector<8x8xf32>
    %239 = tpu.matmul %232, %1, %cst_68 {dimension_numbers = #tpu.dot_dimension_numbers<[1], [1], [0], [0], [0, 0, 1, 0], [], []>} : vector<8x128xf32>, vector<8x128xf32>, vector<8x8xf32> -> vector<8x8xf32>
    %240 = vector.broadcast %235 : vector<8x1xf32> to vector<8x8xf32>
    %241 = vector.broadcast %237 : vector<1x8xf32> to vector<8x8xf32>
    %242 = arith.addf %240, %241 : vector<8x8xf32>
    %cst_69 = arith.constant 2.000000e+00 : f32
    %243 = vector.broadcast %cst_69 : f32 to vector<8x8xf32>
    %244 = arith.mulf %243, %238 : vector<8x8xf32>
    %245 = arith.subf %242, %244 : vector<8x8xf32>
    %cst_70 = arith.constant 0.000000e+00 : f32
    %246 = vector.broadcast %cst_70 : f32 to vector<8x8xf32>
    %247 = arith.maximumf %245, %246 : vector<8x8xf32>
    %248 = vector.broadcast %235 : vector<8x1xf32> to vector<8x8xf32>
    %249 = vector.broadcast %6 : vector<1x8xf32> to vector<8x8xf32>
    %250 = arith.addf %248, %249 : vector<8x8xf32>
    %cst_71 = arith.constant 2.000000e+00 : f32
    %251 = vector.broadcast %cst_71 : f32 to vector<8x8xf32>
    %252 = arith.mulf %251, %239 : vector<8x8xf32>
    %253 = arith.subf %250, %252 : vector<8x8xf32>
    %cst_72 = arith.constant 0.000000e+00 : f32
    %254 = vector.broadcast %cst_72 : f32 to vector<8x8xf32>
    %255 = arith.maximumf %253, %254 : vector<8x8xf32>
    %256 = vector.shape_cast %247 : vector<8x8xf32> to vector<1x8x8xf32>
    %cst_73 = arith.constant dense<0.000000e+00> : vector<1xf32>
    %257 = vector.multi_reduction <add>, %256, %cst_73 [1, 2] : vector<1x8x8xf32> to vector<1xf32>
    %258 = vector.shape_cast %257 : vector<1xf32> to vector<1x1x1xf32>
    %259 = vector.extract %258[0, 0, 0] : f32 from vector<1x1x1xf32>
    %260 = vector.broadcast %259 : f32 to vector<1x1xf32>
    %261 = arith.addf %260, %20 : vector<1x1xf32>
    %262 = vector.shape_cast %255 : vector<8x8xf32> to vector<1x8x8xf32>
    %cst_74 = arith.constant dense<0.000000e+00> : vector<1xf32>
    %263 = vector.multi_reduction <add>, %262, %cst_74 [1, 2] : vector<1x8x8xf32> to vector<1xf32>
    %264 = vector.shape_cast %263 : vector<1xf32> to vector<1x1x1xf32>
    %265 = vector.extract %264[0, 0, 0] : f32 from vector<1x1x1xf32>
    %266 = vector.broadcast %265 : f32 to vector<1x1xf32>
    %cst_75 = arith.constant 2.000000e+00 : f32
    %267 = vector.broadcast %cst_75 : f32 to vector<1x1xf32>
    %268 = arith.mulf %267, %266 : vector<1x1xf32>
    %269 = arith.addf %261, %268 : vector<1x1xf32>
    %cst_76 = arith.constant 2.400000e+02 : f32
    %270 = vector.broadcast %cst_76 : f32 to vector<1x1xf32>
    %271 = arith.divf %269, %270 : vector<1x1xf32>
    %cst_77 = arith.constant 4.000000e+00 : f32
    %272 = vector.broadcast %cst_77 : f32 to vector<1x1xf32>
    %273 = arith.divf %271, %272 : vector<1x1xf32>
    %cst_78 = arith.constant 9.99999996E-13 : f32
    %274 = vector.broadcast %cst_78 : f32 to vector<1x1xf32>
    %275 = arith.maximumf %273, %274 : vector<1x1xf32>
    %276 = tpu.reciprocal %275 : vector<1x1xf32> -> vector<1x1xf32>
    %cst_79 = arith.constant -6.250000e-02 : f32
    %277 = vector.broadcast %cst_79 : f32 to vector<1x1xf32>
    %278 = arith.mulf %276, %277 : vector<1x1xf32>
    %279 = vector.broadcast %278 : vector<1x1xf32> to vector<8x8xf32>
    %280 = arith.mulf %247, %279 : vector<8x8xf32>
    %281 = math.exp %280 : vector<8x8xf32>
    %282 = arith.mulf %281, %281 : vector<8x8xf32>
    %283 = arith.addf %281, %282 : vector<8x8xf32>
    %284 = arith.mulf %282, %282 : vector<8x8xf32>
    %285 = arith.addf %283, %284 : vector<8x8xf32>
    %286 = arith.mulf %284, %284 : vector<8x8xf32>
    %287 = arith.addf %285, %286 : vector<8x8xf32>
    %288 = arith.mulf %286, %286 : vector<8x8xf32>
    %289 = arith.addf %287, %288 : vector<8x8xf32>
    %290 = vector.shape_cast %289 : vector<8x8xf32> to vector<1x8x8xf32>
    %cst_80 = arith.constant dense<0.000000e+00> : vector<1xf32>
    %291 = vector.multi_reduction <add>, %290, %cst_80 [1, 2] : vector<1x8x8xf32> to vector<1xf32>
    %292 = vector.shape_cast %291 : vector<1xf32> to vector<1x1x1xf32>
    %293 = vector.extract %292[0, 0, 0] : f32 from vector<1x1x1xf32>
    %294 = vector.broadcast %293 : f32 to vector<1x1xf32>
    %295 = vector.broadcast %278 : vector<1x1xf32> to vector<8x8xf32>
    %296 = arith.mulf %15, %295 : vector<8x8xf32>
    %297 = math.exp %296 : vector<8x8xf32>
    %298 = arith.mulf %297, %297 : vector<8x8xf32>
    %299 = arith.addf %297, %298 : vector<8x8xf32>
    %300 = arith.mulf %298, %298 : vector<8x8xf32>
    %301 = arith.addf %299, %300 : vector<8x8xf32>
    %302 = arith.mulf %300, %300 : vector<8x8xf32>
    %303 = arith.addf %301, %302 : vector<8x8xf32>
    %304 = arith.mulf %302, %302 : vector<8x8xf32>
    %305 = arith.addf %303, %304 : vector<8x8xf32>
    %306 = vector.shape_cast %305 : vector<8x8xf32> to vector<1x8x8xf32>
    %cst_81 = arith.constant dense<0.000000e+00> : vector<1xf32>
    %307 = vector.multi_reduction <add>, %306, %cst_81 [1, 2] : vector<1x8x8xf32> to vector<1xf32>
    %308 = vector.shape_cast %307 : vector<1xf32> to vector<1x1x1xf32>
    %309 = vector.extract %308[0, 0, 0] : f32 from vector<1x1x1xf32>
    %310 = vector.broadcast %309 : f32 to vector<1x1xf32>
    %311 = arith.addf %294, %310 : vector<1x1xf32>
    %312 = vector.broadcast %278 : vector<1x1xf32> to vector<8x8xf32>
    %313 = arith.mulf %255, %312 : vector<8x8xf32>
    %314 = math.exp %313 : vector<8x8xf32>
    %315 = arith.mulf %314, %314 : vector<8x8xf32>
    %316 = arith.addf %314, %315 : vector<8x8xf32>
    %317 = arith.mulf %315, %315 : vector<8x8xf32>
    %318 = arith.addf %316, %317 : vector<8x8xf32>
    %319 = arith.mulf %317, %317 : vector<8x8xf32>
    %320 = arith.addf %318, %319 : vector<8x8xf32>
    %321 = arith.mulf %319, %319 : vector<8x8xf32>
    %322 = arith.addf %320, %321 : vector<8x8xf32>
    %323 = vector.shape_cast %322 : vector<8x8xf32> to vector<1x8x8xf32>
    %cst_82 = arith.constant dense<0.000000e+00> : vector<1xf32>
    %324 = vector.multi_reduction <add>, %323, %cst_82 [1, 2] : vector<1x8x8xf32> to vector<1xf32>
    %325 = vector.shape_cast %324 : vector<1xf32> to vector<1x1x1xf32>
    %326 = vector.extract %325[0, 0, 0] : f32 from vector<1x1x1xf32>
    %327 = vector.broadcast %326 : f32 to vector<1x1xf32>
    %cst_83 = arith.constant 2.000000e+00 : f32
    %328 = vector.broadcast %cst_83 : f32 to vector<1x1xf32>
    %329 = arith.mulf %328, %327 : vector<1x1xf32>
    %330 = arith.subf %311, %329 : vector<1x1xf32>
    %cst_84 = arith.constant 1.562500e-02 : f32
    %331 = vector.broadcast %cst_84 : f32 to vector<1x1xf32>
    %332 = arith.mulf %330, %331 : vector<1x1xf32>
    %333 = vector.shape_cast %332 : vector<1x1xf32> to vector<1x1xf32>
    %334 = vector.broadcast %333 : vector<1x1xf32> to vector<8x128xf32>
    %c0_85 = arith.constant 0 : index
    %c256 = arith.constant 256 : index
    %335 = vector.load %arg5[%c0_85, %c256] : memref<8x384xf32, #tpu.memory_space<vmem>>, vector<8x128xf32>
    tpu.vector_store %arg5[%c0_85, %c256], %334 {strides = array<i32>} : memref<8x384xf32, #tpu.memory_space<vmem>>, vector<8x128xf32>,
    return
  }
  func.func @transform_0(%arg0: i32) -> (i32, i32, i32) {
    %c0_i32 = arith.constant 0 : i32
    %c0_i32_0 = arith.constant 0 : i32
    %c0_i32_1 = arith.constant 0 : i32
    %c0_i32_2 = arith.constant 0 : i32
    return %c0_i32, %c0_i32_0, %c0_i32_1 : i32, i32, i32
  }
  func.func @transform_1(%arg0: i32) -> (i32, i32, i32) {
    %c0_i32 = arith.constant 0 : i32
    %c0_i32_0 = arith.constant 0 : i32
    %c0_i32_1 = arith.constant 0 : i32
    return %arg0, %c0_i32, %c0_i32_0 : i32, i32, i32
  }
  func.func @transform_2(%arg0: i32) -> (i32, i32, i32) {
    %c0_i32 = arith.constant 0 : i32
    %c0_i32_0 = arith.constant 0 : i32
    %c0_i32_1 = arith.constant 0 : i32
    %c0_i32_2 = arith.constant 0 : i32
    return %c0_i32, %c0_i32_0, %c0_i32_1 : i32, i32, i32
  }
  func.func @transform_3(%arg0: i32) -> (i32, i32, i32) {
    %c0_i32 = arith.constant 0 : i32
    %c0_i32_0 = arith.constant 0 : i32
    %c0_i32_1 = arith.constant 0 : i32
    return %arg0, %c0_i32, %c0_i32_0 : i32, i32, i32
  }
  func.func @transform_4(%arg0: i32) -> (i32, i32) {
    %c0_i32 = arith.constant 0 : i32
    %c0_i32_0 = arith.constant 0 : i32
    return %arg0, %c0_i32 : i32, i32
  }
}

</mosaic_0001>

<bundles_post_ra>
// kernel: transfer_mmd_loss_forward.1
= control target key start
LH: loop header
LB: loop body
LE: loop exit
PB: predicated region body
PF: predicated region fallthrough
CT: control target
= control target key end

     0   :  { %s968_s15 = smov 0   ;;  %s1083_s0 = inlined_call_operand.vmem [shape: f32[3,8,128], index: 0, kind: input, shape index: {}]   ;;  %s1084_s1 = inlined_call_operand.vmem [shape: f32[2,8,128], index: 1, kind: input, shape index: {}]   ;;  %s1085_s2 = inlined_call_operand.vmem [shape: f32[3,1,8], index: 2, kind: input, shape index: {}]   ;;  %s1086_s3 = inlined_call_operand.vmem [shape: f32[2,1,8], index: 3, kind: input, shape index: {}]   ;;  %s1087_s4 = inlined_call_operand.vmem [shape: f32[16,384], index: 4, kind: output, shape index: {}]  }
   0x1 LB: > { %s845_s16 = sadd.s32 4294967295, %s939_s15   ;;  %p849_p0 = scmp.ge.s32.totalorder %s939_s15, 1  ;;  %s939_s15 = sphi %s968_s15, %s14_s15  }
   0x2   : > { %p169_p1 = scmp.lt.s32.totalorder %s939_s15, 3 }
   0x4   : > { %p170_p2 = pnand %p849_p0, %p169_p1 }
   0x5   : > { %p197_p3 = scmp.lt.s32.totalorder (!%p170_p2), %s845_s16, 1 }
   0x6   : > { %173 = sbr.rel (%p170_p2) target bundleno = 1062 (0x426), region = 36 }
   0xb   : > { %v253_v0 = vld [vmem:[%s1083_s0] sm:$0xff]  ;;  %s1089_s16 = smov (!%p197_p3, %s845_s16), 1  ;;  %v852_v4 = vld [vmem:[%s1083_s0 + $0x8] sm:$0xff]  ;;  %vm241_vm0 = vcmask 64512   ;;  %v941_v49 = vmov 240.0   ;;  %v942_v50 = vmov 4.0  }
   0xc   : > { %273 = vmatpush.xpose.msra.mxu1 %v253_v0  ;;  %s850_s19 = sshll.u32 %s1089_s16, 3  ;;  %s203_s22 = scalar_lea.vmem %s1086_s3, %s1089_s16  ;;  %v254_v3 = vmul.f32 %v253_v0, %v253_v0  ;;  %459 = vmatpush.xpose.msra.mxu3 %v852_v4  ;;  %v902_v7 = vld [vmem:[%s1085_s2] ss:$0 sm:$0xff]  ;;  %v439_v27 = vmul.f32 %v852_v4, %v852_v4  ;;  %905 = vrcp.f32 %v941_v49 }
   0xd   : > { %s200_s25 = scalar_lea.vmem %s1084_s1, %s850_s19  ;;  %v992_v6 = vld [vmem:[%s203_s22] ss:$0 sm:$0xff]  ;;  %907 = vrcp.f32 %v942_v50  ;;  %s858_s14 = smul.u32 24, %s1089_s16 }
   0xe   : > { %v209_v1 = vld [vmem:[%s200_s25] sm:$0xff] }
   0xf   : > { %274 = vmatmul.f32.vlgmr.msra.gmra.mxu1 %v253_v0  ;;  %229 = vmatpush.xpose.msra.mxu0 %v209_v1  ;;  %v210_v2 = vmul.f32 %v209_v1, %v209_v1  ;;  %s1045_s19 = scalar_lea.vmem %s1087_s4, %s858_s14 }
  0x10   : > { %293 = vmatpush.xpose.msra.mxu2 %v209_v1  ;;  %460 = vmatmul.f32.vlgmr.msra.gmra.mxu3 %v852_v4 }
  0x11   : > { %211 = vadd.xlane.f32.xlu0 %v210_v2 }
  0x12   : > { %230 = vmatmul.f32.vlgmr.msra.gmra.mxu0 %v209_v1  ;;  %v906_v51 = vpop.eup %905 }
  0x13   : > { %479 = vmatpush.xpose.msrb.mxu0 %v209_v1  ;;  %294 = vmatmul.f32.vlgmr.msra.gmra.mxu2 %v253_v0  ;;  %v908_v52 = vpop.eup %907  ;;  %v335_v53 = vmul.f32 240.0, %v906_v51  ;;  %vm339_vm1 = vweird.f32 %v906_v51 }
  0x14   : > { %651 = vmatpush.xpose.msrb.mxu2 %v209_v1  ;;  %v343_v54 = vmul.f32 4.0, %v908_v52  ;;  %vm347_vm2 = vweird.f32 %v908_v52 }
  0x15   : > { %v336_v55 = vsub.f32 1.0, %v335_v53 }
  0x16   : > { %v344_v56 = vsub.f32 1.0, %v343_v54 }
  0x17   : > { %v337_v57 = vmul.f32 %v906_v51, %v336_v55 }
  0x18   : > { %v345_v58 = vmul.f32 %v908_v52, %v344_v56 }
  0x19   : > { %255 = vadd.xlane.f32.xlu0 %v254_v3  ;;  %v338_v59 = vadd.f32 %v906_v51, %v337_v57 }
  0x1a   : > { %480 = vmatmul.f32.vlgmr.msrb.gmra.mxu0 %v852_v4  ;;  %v346_v0 = vadd.f32 %v908_v52, %v345_v58 }
  0x1b   : > { %v1014_v2 = vsel %vm339_vm1, %v906_v51, %v338_v59 }
  0x1c   : > { %v1016_v4 = vsel %vm347_vm2, %v908_v52, %v346_v0 }
  0x84   : > { %v212_v5 = vpop.xlane.xlu0 %211 }
  0x85   : > { %v237_v9 = vadd.f32 %v992_v6, %v212_v5 }
  0x8c   : > { %v275_v8 = vpop.f32.mrf.mxu1  ;;  %v256_v11 = vpop.xlane.xlu0 %255 }
  0x8d   : > { %v301_v13 = vadd.f32 %v902_v7, %v256_v11  ;;  %v302_v14 = vmul.f32 2.0, %v275_v8  ;;  %v305_v17 = vadd.f32 %v992_v6, %v256_v11 }
  0x8f   : > { %v231_v10 = vpop.f32.mrf.mxu0  ;;  %v303_v18 = vsub.f32 %v301_v13, %v302_v14 }
  0x90   : > { %v238_v12 = vmul.f32 2.0, %v231_v10 }
  0x91   : > { %v1003_v23 = vmax.f32 %v303_v18, 0.0 }
  0x92   : > { %v239_v15 = vsub.f32 %v237_v9, %v238_v12 }
  0x93   : > { %v309_v26 = vsel %vm241_vm0, %v1003_v23, 0.0 }
  0x94   : > { %v998_v16 = vmax.f32 %v239_v15, 0.0 }
  0x96   : > { %v295_v19 = vpop.f32.mrf.mxu2  ;;  %v242_v21 = vsel %vm241_vm0, %v998_v16, 0.0 }
  0x97   : > { %v306_v20 = vmul.f32 2.0, %v295_v19  ;;  %243 = vadd.xlane.f32.xlu1 %v242_v21 }
  0x99   : > { %v307_v22 = vsub.f32 %v305_v17, %v306_v20 }
  0x9b   : > { %v1005_v24 = vmax.f32 %v307_v22, 0.0 }
  0x9d   : > { %v321_v25 = vsel %vm241_vm0, %v1005_v24, 0.0 }
  0x9e   : > { %322 = vadd.xlane.f32.xlu2 %v321_v25 }
  0x9f   : > { %310 = vadd.xlane.f32.xlu1 %v309_v26  ;;  %v854_v26 = vld [vmem:[%s1083_s0 + $0x10] sm:$0xff] }
  0xa0   : > { %631 = vmatpush.xpose.msrb.mxu1 %v854_v26  ;;  %652 = vmatmul.f32.vlgmr.msrb.gmra.mxu2 %v854_v26 }
  0xa3   : > { %632 = vmatmul.f32.vlgmr.msrb.gmra.mxu1 %v854_v26 }
  0xa6   : > { %440 = vadd.xlane.f32.xlu2 %v439_v27 }
 0x10a   : > { %v244_v28 = vpop.xlane.xlu1 %243 }
 0x10b   : > { %v245_v29 = vrot.slane %v244_v28, 4 }
 0x10d   : > { %v246_v30 = vadd.f32 %v245_v29, %v244_v28 }
 0x10f   : > { %v247_v31 = vrot.slane %v246_v30, 2 }
 0x111   : > { %v323_v32 = vpop.xlane.xlu2 %322  ;;  %v248_v34 = vadd.f32 %v247_v31, %v246_v30 }
 0x112   : > { %v324_v33 = vrot.slane %v323_v32, 4  ;;  %v311_v35 = vpop.xlane.xlu1 %310 }
 0x113   : > { %v312_v37 = vrot.slane %v311_v35, 4  ;;  %v249_v38 = vrot.slane %v248_v34, 1 }
 0x114   : > { %v325_v36 = vadd.f32 %v324_v33, %v323_v32  ;;  %v481_v32 = vpop.f32.mrf.mxu0 }
 0x115   : > { %v313_v40 = vadd.f32 %v312_v37, %v311_v35  ;;  %v250_v41 = vadd.f32 %v249_v38, %v248_v34  ;;  %v903_v35 = vld [vmem:[%s1085_s2 + $0x1] ss:$0 sm:$0xff] }
 0x116   : > { %v326_v39 = vrot.slane %v325_v36, 2 }
 0x117   : > { %v314_v42 = vrot.slane %v313_v40, 2  ;;  %859 = vpush %v250_v41  ;;  %v492_v41 = vmul.f32 2.0, %v481_v32 }
 0x118   : > { %v327_v43 = vadd.f32 %v326_v39, %v325_v36 }
 0x119   : > { %v315_v44 = vadd.f32 %v314_v42, %v313_v40  ;;  %v441_v39 = vpop.xlane.xlu2 %440 }
 0x11a   : > { %v328_v45 = vrot.slane %v327_v43, 1  ;;  %v487_v50 = vadd.f32 %v903_v35, %v441_v39  ;;  %v491_v51 = vadd.f32 %v992_v6, %v441_v39 }
 0x11b   : > { %v316_v46 = vrot.slane %v315_v44, 1 }
 0x11c   : > { %v329_v48 = vadd.f32 %v328_v45, %v327_v43 }
 0x11d   : > { %v317_v47 = vadd.f32 %v316_v46, %v315_v44 }
 0x11f   : > { %861 = vpush %v317_v47 }
 0x120   : > { %863 = vpush %v329_v48 }
 0x148   : > { %s860_s30 = spop %859 }
 0x149   : > { %v1011_v60 = vstv %s860_s30 }
 0x150   : > { %s862_s5 = spop %861 }
 0x151   : > { %v319_v61 = vstv %s862_s5  ;;  %s864_s6 = spop %863 }
 0x152   : > { %v320_v62 = vadd.f32 %v319_v61, %v1011_v60  ;;  %v331_v63 = vstv %s864_s6 }
 0x153   : > { %v332_v1 = vmul.f32 2.0, %v331_v63  ;;  %v493_v63 = vsub.f32 %v491_v51, %v492_v41 }
 0x155   : > { %v333_v3 = vadd.f32 %v332_v1, %v320_v62 }
 0x157   : > { %v341_v5 = vmul.f32 %v1014_v2, %v333_v3 }
 0x159   : > { %v349_v7 = vmul.f32 %v1016_v4, %v341_v5 }
 0x15b   : > { %v350_v8 = vmax.f32 %v349_v7, 1e-12 }
 0x15d   : > { %909 = vrcp.f32 %v350_v8  ;;  %v362_v12 = vand.u32 2147483648, %v350_v8  ;;  %v360_v14 = vand.u32 2147483647, %v350_v8  ;;  %vm356_vm4 = vweird.f32 %v350_v8 }
 0x15f   : > { %v363_v17 = vor.u32 1.1754944e-38, %v362_v12  ;;  %vm361_vm6 = vcmp.eq.f32.partialorder %v360_v14, 8.507059e+37  ;;  %v611_v12 = vmul.f32 %v854_v26, %v854_v26 }
 0x163   : > { %v910_v9 = vpop.eup %909 }
 0x164   : > { %v352_v10 = vmul.f32 %v910_v9, %v350_v8  ;;  %vm357_vm3 = vweird.f32 %v910_v9  ;;  %v1033_v8 = vmax.f32 %v493_v63, 0.0 }
 0x165   : > { %vm358_vm5 = vmor %vm356_vm4, %vm357_vm3 }
 0x166   : > { %v353_v11 = vsub.f32 1.0, %v352_v10  ;;  %v507_v10 = vsel %vm241_vm0, %v1033_v8, 0.0 }
 0x168   : > { %v354_v13 = vmul.f32 %v910_v9, %v353_v11 }
 0x16a   : > { %v355_v15 = vadd.f32 %v910_v9, %v354_v13 }
 0x16c   : > { %v359_v18 = vsel %vm358_vm5, %v910_v9, %v355_v15 }
 0x16d   : > { %v364_v19 = vsel %vm361_vm6, %v363_v17, %v359_v18 }
 0x16e   : > { %v365_v20 = vmul.f32 -0.0625, %v364_v19 }
 0x170   : > { %v411_v21 = vmul.f32 %v365_v20, %v1005_v24  ;;  %v388_v22 = vmul.f32 %v365_v20, %v998_v16  ;;  %v366_v25 = vmul.f32 %v365_v20, %v1003_v23  ;;  %v461_v24 = vpop.f32.mrf.mxu3 }
 0x171   : > { %v488_v40 = vmul.f32 2.0, %v461_v24 }
 0x172   : > { %v412_v27 = vmul.f32 1.442695, %v411_v21  ;;  %v389_v28 = vmul.f32 1.442695, %v388_v22  ;;  %v367_v29 = vmul.f32 1.442695, %v366_v25 }
 0x173   : > { %v489_v3 = vsub.f32 %v487_v50, %v488_v40 }
 0x174   : > { %911 = vpow2.f32 %v412_v27 }
 0x175   : > { %913 = vpow2.f32 %v389_v28  ;;  %v1035_v9 = vmax.f32 %v489_v3, 0.0 }
 0x176   : > { %915 = vpow2.f32 %v367_v29 }
 0x177   : > { %v495_v11 = vsel %vm241_vm0, %v1035_v9, 0.0 }
 0x17a   : > { %v912_v30 = vpop.eup %911 }
 0x17b   : > { %v914_v31 = vpop.eup %913  ;;  %v414_v33 = vmul.f32 %v912_v30, %v912_v30 }
 0x17c   : > { %v916_v34 = vpop.eup %915  ;;  %v391_v23 = vmul.f32 %v914_v31, %v914_v31 }
 0x17d   : > { %v415_v36 = vadd.f32 %v912_v30, %v414_v33  ;;  %v416_v37 = vmul.f32 %v414_v33, %v414_v33  ;;  %v369_v38 = vmul.f32 %v916_v34, %v916_v34 }
 0x17e   : > { %v392_v42 = vadd.f32 %v914_v31, %v391_v23  ;;  %v393_v43 = vmul.f32 %v391_v23, %v391_v23 }
 0x17f   : > { %v417_v44 = vadd.f32 %v416_v37, %v415_v36  ;;  %v418_v45 = vmul.f32 %v416_v37, %v416_v37  ;;  %v370_v46 = vadd.f32 %v916_v34, %v369_v38  ;;  %v371_v47 = vmul.f32 %v369_v38, %v369_v38 }
 0x180   : > { %v394_v48 = vadd.f32 %v393_v43, %v392_v42  ;;  %v395_v49 = vmul.f32 %v393_v43, %v393_v43 }
 0x181   : > { %v419_v52 = vadd.f32 %v418_v45, %v417_v44  ;;  %v420_v53 = vmul.f32 %v418_v45, %v418_v45  ;;  %v372_v54 = vadd.f32 %v371_v47, %v370_v46  ;;  %v373_v55 = vmul.f32 %v371_v47, %v371_v47 }
 0x182   : > { %v396_v56 = vadd.f32 %v395_v49, %v394_v48  ;;  %v397_v57 = vmul.f32 %v395_v49, %v395_v49 }
 0x183   : > { %v421_v58 = vadd.f32 %v420_v53, %v419_v52  ;;  %v374_v59 = vadd.f32 %v373_v55, %v372_v54  ;;  %v375_v61 = vmul.f32 %v373_v55, %v373_v55 }
 0x184   : > { %v398_v62 = vadd.f32 %v397_v57, %v396_v56 }
 0x185   : > { %v422_v0 = vsel %vm241_vm0, %v421_v58, 0.0  ;;  %v376_v1 = vadd.f32 %v375_v61, %v374_v59 }
 0x186   : > { %423 = vadd.xlane.f32.xlu2 %v422_v0  ;;  %v399_v5 = vsel %vm241_vm0, %v398_v62, 0.0 }
 0x187   : > { %400 = vadd.xlane.f32.xlu1 %v399_v5  ;;  %v377_v7 = vsel %vm241_vm0, %v376_v1, 0.0 }
 0x188   : > { %378 = vadd.xlane.f32.xlu0 %v377_v7 }
 0x18e   : > { %612 = vadd.xlane.f32.xlu2 %v611_v12 }
 0x18f   : > { %508 = vadd.xlane.f32.xlu1 %v507_v10 }
 0x190   : > { %496 = vadd.xlane.f32.xlu0 %v495_v11 }
 0x1f9   : > { %v424_v13 = vpop.xlane.xlu2 %423 }
 0x1fa   : > { %v401_v14 = vpop.xlane.xlu1 %400  ;;  %v425_v15 = vrot.slane %v424_v13, 4 }
 0x1fb   : > { %v402_v17 = vrot.slane %v401_v14, 4  ;;  %v379_v18 = vpop.xlane.xlu0 %378 }
 0x1fc   : > { %v380_v19 = vrot.slane %v379_v18, 4  ;;  %v426_v20 = vadd.f32 %v425_v15, %v424_v13 }
 0x1fd   : > { %v403_v21 = vadd.f32 %v402_v17, %v401_v14 }
 0x1fe   : > { %v381_v22 = vadd.f32 %v380_v19, %v379_v18  ;;  %v427_v25 = vrot.slane %v426_v20, 2 }
 0x1ff   : > { %v404_v27 = vrot.slane %v403_v21, 2 }
 0x200   : > { %v382_v28 = vrot.slane %v381_v22, 2  ;;  %v428_v29 = vadd.f32 %v427_v25, %v426_v20 }
 0x201   : > { %v405_v30 = vadd.f32 %v404_v27, %v403_v21 }
 0x202   : > { %v509_v31 = vpop.xlane.xlu1 %508  ;;  %v383_v24 = vadd.f32 %v382_v28, %v381_v22  ;;  %v429_v32 = vrot.slane %v428_v29, 1 }
 0x203   : > { %v497_v33 = vpop.xlane.xlu0 %496  ;;  %v510_v26 = vrot.slane %v509_v31, 4  ;;  %v406_v34 = vrot.slane %v405_v30, 1 }
 0x204   : > { %v498_v23 = vrot.slane %v497_v33, 4  ;;  %v384_v35 = vrot.slane %v383_v24, 1  ;;  %v430_v40 = vadd.f32 %v429_v32, %v428_v29  ;;  %v633_v29 = vpop.f32.mrf.mxu1 }
 0x205   : > { %v511_v36 = vadd.f32 %v510_v26, %v509_v31  ;;  %v407_v37 = vadd.f32 %v406_v34, %v405_v30  ;;  %v653_v30 = vpop.f32.mrf.mxu2  ;;  %v613_v34 = vpop.xlane.xlu2 %612 }
 0x206   : > { %v499_v38 = vadd.f32 %v498_v23, %v497_v33  ;;  %v385_v39 = vadd.f32 %v384_v35, %v383_v24  ;;  %v660_v23 = vmul.f32 2.0, %v633_v29  ;;  %v664_v35 = vmul.f32 2.0, %v653_v30 }
 0x207   : > { %v512_v41 = vrot.slane %v511_v36, 2 }
 0x208   : > { %v500_v42 = vrot.slane %v499_v38, 2  ;;  %865 = vpush %v385_v39 }
 0x209   : > { %867 = vpush %v407_v37  ;;  %v513_v43 = vadd.f32 %v512_v41, %v511_v36 }
 0x20a   : > { %869 = vpush %v430_v40  ;;  %v501_v44 = vadd.f32 %v500_v42, %v499_v38 }
 0x20b   : > { %v514_v45 = vrot.slane %v513_v43, 1 }
 0x20c   : > { %v502_v46 = vrot.slane %v501_v44, 1 }
 0x20d   : > { %v515_v47 = vadd.f32 %v514_v45, %v513_v43  ;;  %v663_v45 = vadd.f32 %v992_v6, %v613_v34 }
 0x20e   : > { %v503_v48 = vadd.f32 %v502_v46, %v501_v44 }
 0x210   : > { %871 = vpush %v503_v48 }
 0x211   : > { %873 = vpush %v515_v47 }
 0x239   : > { %s866_s11 = spop %865 }
 0x23a   : > { %v387_v49 = vstv %s866_s11  ;;  %s868_s12 = spop %867 }
 0x23b   : > { %v409_v50 = vstv %s868_s12  ;;  %s870_s13 = spop %869 }
 0x23c   : > { %v410_v51 = vadd.f32 %v409_v50, %v387_v49  ;;  %v432_v52 = vstv %s870_s13 }
 0x23d   : > { %v433_v53 = vmul.f32 2.0, %v432_v52 }
 0x23f   : > { %v434_v54 = vsub.f32 %v410_v51, %v433_v53 }
 0x241   : > { %v435_v55 = vmul.f32 0.015625, %v434_v54  ;;  %s872_s20 = spop %871 }
 0x242   : > { %v505_v56 = vstv %s872_s20  ;;  %s874_s21 = spop %873 }
 0x243   : > { %436 = vst [vmem:[%s1045_s19] sm:$0xff] %v435_v55  ;;  %v506_v57 = vadd.f32 %v505_v56, %v1011_v60  ;;  %v517_v58 = vstv %s874_s21  ;;  %v665_v56 = vsub.f32 %v663_v45, %v664_v35 }
 0x244   : > { %v518_v59 = vmul.f32 2.0, %v517_v58 }
 0x246   : > { %v519_v61 = vadd.f32 %v518_v59, %v506_v57 }
 0x248   : > { %v520_v62 = vmul.f32 %v519_v61, %v1014_v2 }
 0x24a   : > { %v521_v63 = vmul.f32 %v520_v62, %v1016_v4  ;;  %v1061_v62 = vmax.f32 %v665_v56, 0.0 }
 0x24c   : > { %v522_v0 = vmax.f32 %v521_v63, 1e-12 }
 0x24e   : > { %917 = vrcp.f32 %v522_v0  ;;  %v534_v7 = vand.u32 2147483648, %v522_v0  ;;  %v532_v11 = vand.u32 2147483647, %v522_v0  ;;  %vm528_vm8 = vweird.f32 %v522_v0 }
 0x250   : > { %v535_v13 = vor.u32 1.1754944e-38, %v534_v7  ;;  %vm533_vm10 = vcmp.eq.f32.partialorder %v532_v11, 8.507059e+37 }
 0x254   : > { %v918_v1 = vpop.eup %917 }
 0x255   : > { %v524_v3 = vmul.f32 %v918_v1, %v522_v0  ;;  %vm529_vm7 = vweird.f32 %v918_v1  ;;  %v679_v0 = vsel %vm241_vm0, %v1061_v62, 0.0 }
 0x256   : > { %vm530_vm9 = vmor %vm528_vm8, %vm529_vm7 }
 0x257   : > { %v525_v5 = vsub.f32 1.0, %v524_v3 }
 0x259   : > { %v526_v10 = vmul.f32 %v918_v1, %v525_v5 }
 0x25b   : > { %v527_v12 = vadd.f32 %v918_v1, %v526_v10 }
 0x25d   : > { %v531_v14 = vsel %vm530_vm9, %v918_v1, %v527_v12 }
 0x25e   : > { %v536_v15 = vsel %vm533_vm10, %v535_v13, %v531_v14 }
 0x25f   : > { %v537_v17 = vmul.f32 -0.0625, %v536_v15 }
 0x261   : > { %v583_v18 = vmul.f32 %v537_v17, %v1033_v8  ;;  %v560_v19 = vmul.f32 %v537_v17, %v998_v16  ;;  %v538_v20 = vmul.f32 %v537_v17, %v1035_v9  ;;  %v904_v8 = vld [vmem:[%s1085_s2 + $0x2] ss:$0 sm:$0xff] }
 0x262   : > { %v659_v44 = vadd.f32 %v904_v8, %v613_v34 }
 0x263   : > { %v584_v21 = vmul.f32 1.442695, %v583_v18  ;;  %v561_v22 = vmul.f32 1.442695, %v560_v19  ;;  %v539_v25 = vmul.f32 1.442695, %v538_v20 }
 0x264   : > { %v661_v59 = vsub.f32 %v659_v44, %v660_v23 }
 0x265   : > { %919 = vpow2.f32 %v584_v21 }
 0x266   : > { %921 = vpow2.f32 %v561_v22  ;;  %v1063_v63 = vmax.f32 %v661_v59, 0.0 }
 0x267   : > { %923 = vpow2.f32 %v539_v25 }
 0x268   : > { %v667_v1 = vsel %vm241_vm0, %v1063_v63, 0.0 }
 0x26b   : > { %v920_v27 = vpop.eup %919 }
 0x26c   : > { %v922_v28 = vpop.eup %921  ;;  %v586_v31 = vmul.f32 %v920_v27, %v920_v27 }
 0x26d   : > { %v924_v24 = vpop.eup %923  ;;  %v563_v32 = vmul.f32 %v922_v28, %v922_v28 }
 0x26e   : > { %v587_v33 = vadd.f32 %v920_v27, %v586_v31  ;;  %v588_v26 = vmul.f32 %v586_v31, %v586_v31  ;;  %v541_v9 = vmul.f32 %v924_v24, %v924_v24 }
 0x26f   : > { %v564_v36 = vadd.f32 %v922_v28, %v563_v32  ;;  %v565_v37 = vmul.f32 %v563_v32, %v563_v32 }
 0x270   : > { %v589_v38 = vadd.f32 %v588_v26, %v587_v33  ;;  %v590_v39 = vmul.f32 %v588_v26, %v588_v26  ;;  %v542_v40 = vadd.f32 %v924_v24, %v541_v9  ;;  %v543_v41 = vmul.f32 %v541_v9, %v541_v9 }
 0x271   : > { %v566_v42 = vadd.f32 %v565_v37, %v564_v36  ;;  %v567_v43 = vmul.f32 %v565_v37, %v565_v37 }
 0x272   : > { %v591_v46 = vadd.f32 %v590_v39, %v589_v38  ;;  %v592_v47 = vmul.f32 %v590_v39, %v590_v39  ;;  %v544_v48 = vadd.f32 %v543_v41, %v542_v40  ;;  %v545_v49 = vmul.f32 %v543_v41, %v543_v41 }
 0x273   : > { %v568_v50 = vadd.f32 %v567_v43, %v566_v42  ;;  %v569_v51 = vmul.f32 %v567_v43, %v567_v43 }
 0x274   : > { %v593_v52 = vadd.f32 %v592_v47, %v591_v46  ;;  %v546_v53 = vadd.f32 %v545_v49, %v544_v48  ;;  %v547_v54 = vmul.f32 %v545_v49, %v545_v49 }
 0x275   : > { %v570_v55 = vadd.f32 %v569_v51, %v568_v50 }
 0x276   : > { %v594_v57 = vsel %vm241_vm0, %v593_v52, 0.0  ;;  %v548_v58 = vadd.f32 %v547_v54, %v546_v53 }
 0x277   : > { %595 = vadd.xlane.f32.xlu2 %v594_v57  ;;  %v571_v61 = vsel %vm241_vm0, %v570_v55, 0.0 }
 0x278   : > { %572 = vadd.xlane.f32.xlu1 %v571_v61  ;;  %v549_v6 = vsel %vm241_vm0, %v548_v58, 0.0 }
 0x279   : > { %550 = vadd.xlane.f32.xlu0 %v549_v6 }
 0x280   : > { %680 = vadd.xlane.f32.xlu1 %v679_v0 }
 0x281   : > { %668 = vadd.xlane.f32.xlu0 %v667_v1 }
 0x2ea   : > { %v596_v3 = vpop.xlane.xlu2 %595 }
 0x2eb   : > { %v573_v5 = vpop.xlane.xlu1 %572  ;;  %v597_v7 = vrot.slane %v596_v3, 4 }
 0x2ec   : > { %v574_v10 = vrot.slane %v573_v5, 4  ;;  %v551_v11 = vpop.xlane.xlu0 %550 }
 0x2ed   : > { %v552_v12 = vrot.slane %v551_v11, 4  ;;  %v598_v13 = vadd.f32 %v597_v7, %v596_v3 }
 0x2ee   : > { %v575_v14 = vadd.f32 %v574_v10, %v573_v5 }
 0x2ef   : > { %v553_v15 = vadd.f32 %v552_v12, %v551_v11  ;;  %v599_v17 = vrot.slane %v598_v13, 2 }
 0x2f0   : > { %v576_v18 = vrot.slane %v575_v14, 2 }
 0x2f1   : > { %v554_v19 = vrot.slane %v553_v15, 2  ;;  %v600_v20 = vadd.f32 %v599_v17, %v598_v13 }
 0x2f2   : > { %v577_v21 = vadd.f32 %v576_v18, %v575_v14 }
 0x2f3   : > { %v681_v22 = vpop.xlane.xlu1 %680  ;;  %v555_v25 = vadd.f32 %v554_v19, %v553_v15  ;;  %v601_v27 = vrot.slane %v600_v20, 1 }
 0x2f4   : > { %v669_v28 = vpop.xlane.xlu0 %668  ;;  %v682_v29 = vrot.slane %v681_v22, 4  ;;  %v578_v30 = vrot.slane %v577_v21, 1 }
 0x2f5   : > { %v670_v31 = vrot.slane %v669_v28, 4  ;;  %v556_v24 = vrot.slane %v555_v25, 1  ;;  %v602_v9 = vadd.f32 %v601_v27, %v600_v20 }
 0x2f6   : > { %v683_v32 = vadd.f32 %v682_v29, %v681_v22  ;;  %v579_v8 = vadd.f32 %v578_v30, %v577_v21 }
 0x2f7   : > { %v671_v33 = vadd.f32 %v670_v31, %v669_v28  ;;  %v557_v26 = vadd.f32 %v556_v24, %v555_v25 }
 0x2f8   : > { %v684_v34 = vrot.slane %v683_v32, 2 }
 0x2f9   : > { %v672_v23 = vrot.slane %v671_v33, 2  ;;  %875 = vpush %v557_v26 }
 0x2fa   : > { %877 = vpush %v579_v8  ;;  %v685_v35 = vadd.f32 %v684_v34, %v683_v32 }
 0x2fb   : > { %879 = vpush %v602_v9  ;;  %v673_v36 = vadd.f32 %v672_v23, %v671_v33 }
 0x2fc   : > { %v686_v37 = vrot.slane %v685_v35, 1 }
 0x2fd   : > { %v674_v38 = vrot.slane %v673_v36, 1 }
 0x2fe   : > { %v687_v39 = vadd.f32 %v686_v37, %v685_v35 }
 0x2ff   : > { %v675_v40 = vadd.f32 %v674_v38, %v673_v36 }
 0x301   : > { %881 = vpush %v675_v40 }
 0x302   : > { %883 = vpush %v687_v39 }
 0x32a   : > { %s876_s23 = spop %875 }
 0x32b   : > { %v559_v41 = vstv %s876_s23  ;;  %s878_s24 = spop %877 }
 0x32c   : > { %v581_v42 = vstv %s878_s24  ;;  %s880_s25 = spop %879 }
 0x32d   : > { %v582_v43 = vadd.f32 %v581_v42, %v559_v41  ;;  %v604_v44 = vstv %s880_s25 }
 0x32e   : > { %v605_v45 = vmul.f32 2.0, %v604_v44 }
 0x330   : > { %v606_v46 = vsub.f32 %v582_v43, %v605_v45 }
 0x332   : > { %v607_v47 = vmul.f32 0.015625, %v606_v46  ;;  %s882_s26 = spop %881 }
 0x333   : > { %v677_v48 = vstv %s882_s26  ;;  %s884_s27 = spop %883 }
 0x334   : > { %608 = vst [vmem:[%s1045_s19 + $0x8] sm:$0xff] %v607_v47  ;;  %v678_v49 = vadd.f32 %v677_v48, %v1011_v60  ;;  %v689_v50 = vstv %s884_s27 }
 0x335   : > { %v690_v51 = vmul.f32 2.0, %v689_v50 }
 0x337   : > { %v691_v52 = vadd.f32 %v690_v51, %v678_v49 }
 0x339   : > { %v692_v53 = vmul.f32 %v691_v52, %v1014_v2 }
 0x33b   : > { %v693_v54 = vmul.f32 %v692_v53, %v1016_v4 }
 0x33d   : > { %v694_v55 = vmax.f32 %v693_v54, 1e-12 }
 0x33f   : > { %925 = vrcp.f32 %v694_v55  ;;  %v706_v59 = vand.u32 2147483648, %v694_v55  ;;  %v704_v6 = vand.u32 2147483647, %v694_v55  ;;  %vm700_vm12 = vweird.f32 %v694_v55 }
 0x341   : > { %v707_v60 = vor.u32 1.1754944e-38, %v706_v59  ;;  %vm705_vm14 = vcmp.eq.f32.partialorder %v704_v6, 8.507059e+37 }
 0x345   : > { %v926_v56 = vpop.eup %925 }
 0x346   : > { %v696_v57 = vmul.f32 %v926_v56, %v694_v55  ;;  %vm701_vm11 = vweird.f32 %v926_v56 }
 0x347   : > { %vm702_vm13 = vmor %vm700_vm12, %vm701_vm11 }
 0x348   : > { %v697_v58 = vsub.f32 1.0, %v696_v57 }
 0x34a   : > { %v698_v61 = vmul.f32 %v926_v56, %v697_v58 }
 0x34c   : > { %v699_v0 = vadd.f32 %v926_v56, %v698_v61 }
 0x34e   : > { %v703_v1 = vsel %vm702_vm13, %v926_v56, %v699_v0 }
 0x34f   : > { %v708_v3 = vsel %vm705_vm14, %v707_v60, %v703_v1 }
 0x350   : > { %v709_v5 = vmul.f32 -0.0625, %v708_v3 }
 0x352   : > { %v755_v2 = vmul.f32 %v709_v5, %v1061_v62  ;;  %v732_v4 = vmul.f32 %v709_v5, %v998_v16  ;;  %v710_v7 = vmul.f32 %v709_v5, %v1063_v63 }
 0x354   : > { %v756_v10 = vmul.f32 1.442695, %v755_v2  ;;  %v733_v11 = vmul.f32 1.442695, %v732_v4  ;;  %v711_v12 = vmul.f32 1.442695, %v710_v7 }
 0x356   : > { %927 = vpow2.f32 %v756_v10 }
 0x357   : > { %929 = vpow2.f32 %v733_v11 }
 0x358   : > { %931 = vpow2.f32 %v711_v12 }
 0x35c   : > { %v928_v13 = vpop.eup %927 }
 0x35d   : > { %v930_v14 = vpop.eup %929  ;;  %v758_v15 = vmul.f32 %v928_v13, %v928_v13 }
 0x35e   : > { %v932_v17 = vpop.eup %931  ;;  %v735_v18 = vmul.f32 %v930_v14, %v930_v14 }
 0x35f   : > { %v759_v19 = vadd.f32 %v928_v13, %v758_v15  ;;  %v760_v20 = vmul.f32 %v758_v15, %v758_v15  ;;  %v713_v21 = vmul.f32 %v932_v17, %v932_v17 }
 0x360   : > { %v736_v22 = vadd.f32 %v930_v14, %v735_v18  ;;  %v737_v62 = vmul.f32 %v735_v18, %v735_v18 }
 0x361   : > { %v761_v25 = vadd.f32 %v760_v20, %v759_v19  ;;  %v762_v16 = vmul.f32 %v760_v20, %v760_v20  ;;  %v714_v27 = vadd.f32 %v932_v17, %v713_v21  ;;  %v715_v63 = vmul.f32 %v713_v21, %v713_v21 }
 0x362   : > { %v738_v28 = vadd.f32 %v737_v62, %v736_v22  ;;  %v739_v29 = vmul.f32 %v737_v62, %v737_v62 }
 0x363   : > { %v763_v30 = vadd.f32 %v762_v16, %v761_v25  ;;  %v764_v31 = vmul.f32 %v762_v16, %v762_v16  ;;  %v716_v24 = vadd.f32 %v715_v63, %v714_v27  ;;  %v717_v32 = vmul.f32 %v715_v63, %v715_v63 }
 0x364   : > { %v740_v8 = vadd.f32 %v739_v29, %v738_v28  ;;  %v741_v33 = vmul.f32 %v739_v29, %v739_v29 }
 0x365   : > { %v765_v26 = vadd.f32 %v764_v31, %v763_v30  ;;  %v718_v9 = vadd.f32 %v717_v32, %v716_v24  ;;  %v719_v34 = vmul.f32 %v717_v32, %v717_v32 }
 0x366   : > { %v742_v23 = vadd.f32 %v741_v33, %v740_v8 }
 0x367   : > { %v766_v35 = vsel %vm241_vm0, %v765_v26, 0.0  ;;  %v720_v36 = vadd.f32 %v719_v34, %v718_v9 }
 0x368   : > { %767 = vadd.xlane.f32.xlu1 %v766_v35  ;;  %v743_v37 = vsel %vm241_vm0, %v742_v23, 0.0 }
 0x369   : > { %744 = vadd.xlane.f32.xlu0 %v743_v37  ;;  %v721_v38 = vsel %vm241_vm0, %v720_v36, 0.0 }
 0x36a   : > { %722 = vadd.xlane.f32.xlu2 %v721_v38 }
 0x3db   : > { %v768_v39 = vpop.xlane.xlu1 %767 }
 0x3dc   : > { %v769_v40 = vrot.slane %v768_v39, 4  ;;  %v745_v41 = vpop.xlane.xlu0 %744 }
 0x3dd   : > { %v746_v42 = vrot.slane %v745_v41, 4  ;;  %v723_v43 = vpop.xlane.xlu2 %722 }
 0x3de   : > { %v770_v44 = vadd.f32 %v769_v40, %v768_v39  ;;  %v724_v45 = vrot.slane %v723_v43, 4 }
 0x3df   : > { %v747_v46 = vadd.f32 %v746_v42, %v745_v41 }
 0x3e0   : > { %v771_v47 = vrot.slane %v770_v44, 2  ;;  %v725_v48 = vadd.f32 %v724_v45, %v723_v43 }
 0x3e1   : > { %v748_v49 = vrot.slane %v747_v46, 2 }
 0x3e2   : > { %v772_v50 = vadd.f32 %v771_v47, %v770_v44  ;;  %v726_v51 = vrot.slane %v725_v48, 2 }
 0x3e3   : > { %v749_v52 = vadd.f32 %v748_v49, %v747_v46 }
 0x3e4   : > { %v727_v53 = vadd.f32 %v726_v51, %v725_v48  ;;  %v773_v54 = vrot.slane %v772_v50, 1 }
 0x3e5   : > { %v750_v55 = vrot.slane %v749_v52, 1 }
 0x3e6   : > { %v728_v56 = vrot.slane %v727_v53, 1  ;;  %v774_v59 = vadd.f32 %v773_v54, %v772_v50 }
 0x3e7   : > { %v751_v57 = vadd.f32 %v750_v55, %v749_v52 }
 0x3e8   : > { %v729_v58 = vadd.f32 %v728_v56, %v727_v53 }
 0x3ea   : > { %885 = vpush %v729_v58 }
 0x3eb   : > { %887 = vpush %v751_v57 }
 0x3ec   : > { %889 = vpush %v774_v59 }
 0x41b   : > { %s886_s28 = spop %885 }
 0x41c   : > { %v731_v61 = vstv %s886_s28  ;;  %s888_s29 = spop %887 }
 0x41d   : > { %v753_v6 = vstv %s888_s29  ;;  %s890_s30 = spop %889 }
 0x41e   : > { %v754_v0 = vadd.f32 %v753_v6, %v731_v61  ;;  %v776_v60 = vstv %s890_s30 }
 0x41f   : > { %v777_v1 = vmul.f32 2.0, %v776_v60 }
 0x421   : > { %v778_v3 = vsub.f32 %v754_v0, %v777_v1 }
 0x423   : > { %v779_v5 = vmul.f32 0.015625, %v778_v3 }
 0x425   : > { %780 = vst [vmem:[%s1045_s19 + $0x10] sm:$0xff] %v779_v5 }
 0x426 PF: > { %s14_s15 = sadd.s32 1, %s939_s15  }
 0x427   : > { %p11_p4 = scmp.ge.s32.totalorder %s14_s15, 4  }
 0x429   :  { %13 = sbr.rel (!%p11_p4) target bundleno = 1 (0x1), region = 73 }

</bundles_post_ra>
